<compile_context>
chip_gen: v6e
topology: v6e:2x2x1
jax: 0.10.0
libtpu: 0.0.40
codegen_flags: <defaults>
</compile_context>

<pallas_src>
import functools
import math

import jax
import jax.numpy as jnp
from jax import lax
from jax.experimental import pallas as pl
from jax.experimental.pallas import tpu as pltpu

_LANE = 128
_MAX_BLOCK_ROWS = 1024  # 1024x128 f32 = 0.5 MiB per tile; well within VMEM.


def _round_up(v, m):
    return ((v + m - 1) // m) * m


def _fmix32(x):
    """murmur3 finalizer: uint32 -> well-mixed uint32 (pure VPU ops)."""
    x = x ^ (x >> 16)
    x = x * jnp.uint32(0x85EBCA6B)
    x = x ^ (x >> 13)
    x = x * jnp.uint32(0xC2B2AE35)
    x = x ^ (x >> 16)
    return x


def _bits_to_open_unit(bits):
    """uint32 bits -> float32 uniform in (0, 1] via exponent bit-trick."""
    f = lax.bitcast_convert_type((bits >> 9) | jnp.uint32(0x3F800000), jnp.float32)
    return jnp.float32(2.0) - f  # f in [1,2)  ->  (0,1]


def _bits_to_half_open_unit(bits):
    """uint32 bits -> float32 uniform in [0, 1) via exponent bit-trick."""
    f = lax.bitcast_convert_type((bits >> 9) | jnp.uint32(0x3F800000), jnp.float32)
    return f - jnp.float32(1.0)  # f in [1,2)  ->  [0,1)


def _poisson_noise_kernel(x_ref, o_ref, *, key1, key2):
    rows, lanes = x_ref.shape
    half = rows // 2  # wrapper guarantees rows % 16 == 0, so half % 8 == 0

    lam = jnp.maximum(x_ref[...].astype(jnp.float32) * 100.0 + 2.0, 0.0)

    # Unique per-pair counter across the whole grid (stateless, so grid steps
    # are fully independent -> "parallel" semantics is safe).
    pid = pl.program_id(0)
    row = lax.broadcasted_iota(jnp.int32, (half, lanes), 0)
    col = lax.broadcasted_iota(jnp.int32, (half, lanes), 1)
    pair_idx = ((pid * half + row) * lanes + col).astype(jnp.uint32)

    bits1 = _fmix32(pair_idx + jnp.uint32(key1))
    bits2 = _fmix32(pair_idx + jnp.uint32(key2))

    u1 = _bits_to_open_unit(bits1)       # (0, 1]  (safe for log)
    u2 = _bits_to_half_open_unit(bits2)  # [0, 1)

    # Dual-output Box-Muller: one log/sqrt pair -> two standard normals.
    r = jnp.sqrt(jnp.float32(-2.0) * jnp.log(u1))
    theta = jnp.float32(2.0 * math.pi) * u2
    z_cos = r * jnp.cos(theta)
    z_sin = r * jnp.sin(theta)

    # Normal approximation with continuity correction, clipped at 0.
    lam_top = lam[:half, :]
    lam_bot = lam[half:, :]
    k_top = jnp.maximum(jnp.floor(lam_top + jnp.sqrt(lam_top) * z_cos + 0.5), 0.0)
    k_bot = jnp.maximum(jnp.floor(lam_bot + jnp.sqrt(lam_bot) * z_sin + 0.5), 0.0)

    o_ref[:half, :] = (k_top * jnp.float32(0.01)).astype(o_ref.dtype)
    o_ref[half:, :] = (k_bot * jnp.float32(0.01)).astype(o_ref.dtype)


@functools.partial(jax.jit, static_argnames=("seed",))
def poisson_noise(x, seed: int = 0):
    """Pallas equivalent of torch.poisson(x * 100 + 2) / 100 (elementwise)."""
    orig_shape = x.shape
    n = x.size

    flat = x.reshape(-1)
    n_pad = _round_up(n, _LANE)
    if n_pad != n:
        # Pad only to the next 128-lane row (needed for the 2-D reshape).
        flat = jnp.pad(flat, (0, n_pad - n))
    rows = n_pad // _LANE
    x2d = flat.reshape(rows, _LANE)

    # Large blocks to amortize per-grid-step overhead; multiple of 16 so the
    # in-kernel half-split lands on an (8, 128) tile boundary.
    block_rows = min(_MAX_BLOCK_ROWS, _round_up(rows, 16))
    grid = (pl.cdiv(rows, block_rows),)

    # Mix the user seed into two distinct stream keys (avoids
    # seed/program_id collisions of the previous `seed + program_id` scheme).
    key1 = (int(seed) * 0x9E3779B9 + 0x3243F6A9) & 0xFFFFFFFF
    key2 = (int(seed) * 0x9E3779B9 + 0xB7E15163) & 0xFFFFFFFF

    out2d = pl.pallas_call(
        functools.partial(_poisson_noise_kernel, key1=key1, key2=key2),
        out_shape=jax.ShapeDtypeStruct((rows, _LANE), x.dtype),
        grid=grid,
        in_specs=[pl.BlockSpec((block_rows, _LANE), lambda i: (i, 0))],
        out_specs=pl.BlockSpec((block_rows, _LANE), lambda i: (i, 0)),
        compiler_params=pltpu.CompilerParams(
            dimension_semantics=("parallel",),
        ),
    )(x2d)

    return out2d.reshape(-1)[:n].reshape(orig_shape)


if __name__ == "__main__":
    key = jax.random.PRNGKey(0)
    # NCHW input, like the PyTorch module would see (e.g. an image batch in [0,1]).
    x = jax.random.uniform(key, (2, 4, 16, 16), dtype=jnp.float32)

    y = poisson_noise(x, seed=0)
    y = jax.block_until_ready(y)

    # Sanity checks: shape/dtype match, values are non-negative, and the
    # sample mean tracks E[Poisson(100x + 2) / 100] = x + 0.02.
    assert y.shape == x.shape and y.dtype == x.dtype
    assert bool(jnp.all(y >= 0.0))
    mean_err = float(jnp.abs(jnp.mean(y) - jnp.mean(x) - 0.02))
    assert mean_err < 0.05, mean_err

    print("KERNEL_OK")
</pallas_src>

<mosaic_0001>
module attributes {stable_mosaic.version = 11 : i64} {
  func.func @_poisson_noise_kernel(%arg0: i32, %arg1: memref<16x128xf32, #tpu.memory_space<vmem>>, %arg2: memref<16x128xf32, #tpu.memory_space<vmem>>) attributes {dimension_semantics = [#tpu.dimension_semantics<parallel>], iteration_bounds = array<i64: 1>, scalar_prefetch = 0 : i64, scratch_operands = 0 : i64, tpu.core_type = #tpu.core_type<tc>, window_params = [{transform_indices = @transform_0, window_bounds = array<i64: 16, 128>}, {transform_indices = @transform_1, window_bounds = array<i64: 16, 128>}]} {
    %c0 = arith.constant 0 : index
    %c0_0 = arith.constant 0 : index
    %0 = vector.load %arg1[%c0, %c0_0] : memref<16x128xf32, #tpu.memory_space<vmem>>, vector<16x128xf32>
    %cst = arith.constant 1.000000e+02 : f32
    %1 = vector.broadcast %cst : f32 to vector<16x128xf32>
    %2 = arith.mulf %0, %1 : vector<16x128xf32>
    %cst_1 = arith.constant 2.000000e+00 : f32
    %3 = vector.broadcast %cst_1 : f32 to vector<16x128xf32>
    %4 = arith.addf %2, %3 : vector<16x128xf32>
    %cst_2 = arith.constant 0.000000e+00 : f32
    %5 = vector.broadcast %cst_2 : f32 to vector<16x128xf32>
    %6 = arith.maximumf %4, %5 : vector<16x128xf32>
    %7 = tpu.iota {dimensions = array<i32: 0>} : vector<8x128xi32>
    %8 = tpu.iota {dimensions = array<i32: 1>} : vector<8x128xi32>
    %c8_i32 = arith.constant 8 : i32
    %9 = arith.muli %arg0, %c8_i32 : i32
    %10 = vector.broadcast %9 : i32 to vector<8x128xi32>
    %11 = arith.addi %10, %7 : vector<8x128xi32>
    %c128_i32 = arith.constant 128 : i32
    %12 = vector.broadcast %c128_i32 : i32 to vector<8x128xi32>
    %13 = arith.muli %11, %12 : vector<8x128xi32>
    %14 = arith.addi %13, %8 : vector<8x128xi32>
    %c843314857_i32 = arith.constant 843314857 : i32
    %15 = vector.broadcast %c843314857_i32 : i32 to vector<8x128xi32>
    %16 = arith.addi %14, %15 : vector<8x128xi32>
    %c16_i32 = arith.constant 16 : i32
    %17 = vector.broadcast %c16_i32 : i32 to vector<8x128xi32>
    %18 = arith.shrui %16, %17 : vector<8x128xi32>
    %19 = arith.xori %16, %18 : vector<8x128xi32>
    %c-2048144789_i32 = arith.constant -2048144789 : i32
    %20 = vector.broadcast %c-2048144789_i32 : i32 to vector<8x128xi32>
    %21 = arith.muli %19, %20 : vector<8x128xi32>
    %c13_i32 = arith.constant 13 : i32
    %22 = vector.broadcast %c13_i32 : i32 to vector<8x128xi32>
    %23 = arith.shrui %21, %22 : vector<8x128xi32>
    %24 = arith.xori %21, %23 : vector<8x128xi32>
    %c-1028477387_i32 = arith.constant -1028477387 : i32
    %25 = vector.broadcast %c-1028477387_i32 : i32 to vector<8x128xi32>
    %26 = arith.muli %24, %25 : vector<8x128xi32>
    %c16_i32_3 = arith.constant 16 : i32
    %27 = vector.broadcast %c16_i32_3 : i32 to vector<8x128xi32>
    %28 = arith.shrui %26, %27 : vector<8x128xi32>
    %29 = arith.xori %26, %28 : vector<8x128xi32>
    %c-1209970333_i32 = arith.constant -1209970333 : i32
    %30 = vector.broadcast %c-1209970333_i32 : i32 to vector<8x128xi32>
    %31 = arith.addi %14, %30 : vector<8x128xi32>
    %c16_i32_4 = arith.constant 16 : i32
    %32 = vector.broadcast %c16_i32_4 : i32 to vector<8x128xi32>
    %33 = arith.shrui %31, %32 : vector<8x128xi32>
    %34 = arith.xori %31, %33 : vector<8x128xi32>
    %c-2048144789_i32_5 = arith.constant -2048144789 : i32
    %35 = vector.broadcast %c-2048144789_i32_5 : i32 to vector<8x128xi32>
    %36 = arith.muli %34, %35 : vector<8x128xi32>
    %c13_i32_6 = arith.constant 13 : i32
    %37 = vector.broadcast %c13_i32_6 : i32 to vector<8x128xi32>
    %38 = arith.shrui %36, %37 : vector<8x128xi32>
    %39 = arith.xori %36, %38 : vector<8x128xi32>
    %c-1028477387_i32_7 = arith.constant -1028477387 : i32
    %40 = vector.broadcast %c-1028477387_i32_7 : i32 to vector<8x128xi32>
    %41 = arith.muli %39, %40 : vector<8x128xi32>
    %c16_i32_8 = arith.constant 16 : i32
    %42 = vector.broadcast %c16_i32_8 : i32 to vector<8x128xi32>
    %43 = arith.shrui %41, %42 : vector<8x128xi32>
    %44 = arith.xori %41, %43 : vector<8x128xi32>
    %c9_i32 = arith.constant 9 : i32
    %45 = vector.broadcast %c9_i32 : i32 to vector<8x128xi32>
    %46 = arith.shrui %29, %45 : vector<8x128xi32>
    %c1065353216_i32 = arith.constant 1065353216 : i32
    %47 = vector.broadcast %c1065353216_i32 : i32 to vector<8x128xi32>
    %48 = arith.ori %46, %47 : vector<8x128xi32>
    %49 = tpu.bitcast %48 : vector<8x128xi32> -> vector<8x128xf32>
    %cst_9 = arith.constant 2.000000e+00 : f32
    %50 = vector.broadcast %cst_9 : f32 to vector<8x128xf32>
    %51 = arith.subf %50, %49 : vector<8x128xf32>
    %c9_i32_10 = arith.constant 9 : i32
    %52 = vector.broadcast %c9_i32_10 : i32 to vector<8x128xi32>
    %53 = arith.shrui %44, %52 : vector<8x128xi32>
    %c1065353216_i32_11 = arith.constant 1065353216 : i32
    %54 = vector.broadcast %c1065353216_i32_11 : i32 to vector<8x128xi32>
    %55 = arith.ori %53, %54 : vector<8x128xi32>
    %56 = tpu.bitcast %55 : vector<8x128xi32> -> vector<8x128xf32>
    %cst_12 = arith.constant 1.000000e+00 : f32
    %57 = vector.broadcast %cst_12 : f32 to vector<8x128xf32>
    %58 = arith.subf %56, %57 : vector<8x128xf32>
    %59 = math.log %51 : vector<8x128xf32>
    %cst_13 = arith.constant -2.000000e+00 : f32
    %60 = vector.broadcast %cst_13 : f32 to vector<8x128xf32>
    %61 = arith.mulf %60, %59 : vector<8x128xf32>
    %62 = math.sqrt %61 : vector<8x128xf32>
    %cst_14 = arith.constant 6.28318548 : f32
    %63 = vector.broadcast %cst_14 : f32 to vector<8x128xf32>
    %64 = arith.mulf %63, %58 : vector<8x128xf32>
    %65 = math.cos %64 : vector<8x128xf32>
    %66 = arith.mulf %62, %65 : vector<8x128xf32>
    %67 = math.sin %64 : vector<8x128xf32>
    %68 = arith.mulf %62, %67 : vector<8x128xf32>
    %69 = vector.extract_strided_slice %6 {offsets = [0, 0], sizes = [8, 128], strides = [1, 1]} : vector<16x128xf32> to vector<8x128xf32>
    %70 = vector.extract_strided_slice %6 {offsets = [8, 0], sizes = [8, 128], strides = [1, 1]} : vector<16x128xf32> to vector<8x128xf32>
    %71 = math.sqrt %69 : vector<8x128xf32>
    %72 = arith.mulf %71, %66 : vector<8x128xf32>
    %73 = arith.addf %69, %72 : vector<8x128xf32>
    %cst_15 = arith.constant 5.000000e-01 : f32
    %74 = vector.broadcast %cst_15 : f32 to vector<8x128xf32>
    %75 = arith.addf %73, %74 : vector<8x128xf32>
    %76 = math.floor %75 : vector<8x128xf32>
    %cst_16 = arith.constant 0.000000e+00 : f32
    %77 = vector.broadcast %cst_16 : f32 to vector<8x128xf32>
    %78 = arith.maximumf %76, %77 : vector<8x128xf32>
    %79 = math.sqrt %70 : vector<8x128xf32>
    %80 = arith.mulf %79, %68 : vector<8x128xf32>
    %81 = arith.addf %70, %80 : vector<8x128xf32>
    %cst_17 = arith.constant 5.000000e-01 : f32
    %82 = vector.broadcast %cst_17 : f32 to vector<8x128xf32>
    %83 = arith.addf %81, %82 : vector<8x128xf32>
    %84 = math.floor %83 : vector<8x128xf32>
    %cst_18 = arith.constant 0.000000e+00 : f32
    %85 = vector.broadcast %cst_18 : f32 to vector<8x128xf32>
    %86 = arith.maximumf %84, %85 : vector<8x128xf32>
    %cst_19 = arith.constant 0.00999999977 : f32
    %87 = vector.broadcast %cst_19 : f32 to vector<8x128xf32>
    %88 = arith.mulf %78, %87 : vector<8x128xf32>
    %c0_20 = arith.constant 0 : index
    %c0_21 = arith.constant 0 : index
    %89 = vector.load %arg2[%c0_20, %c0_21] : memref<16x128xf32, #tpu.memory_space<vmem>>, vector<8x128xf32>
    tpu.vector_store %arg2[%c0_20, %c0_21], %88 {strides = array<i32>} : memref<16x128xf32, #tpu.memory_space<vmem>>, vector<8x128xf32>,
    %cst_22 = arith.constant 0.00999999977 : f32
    %90 = vector.broadcast %cst_22 : f32 to vector<8x128xf32>
    %91 = arith.mulf %86, %90 : vector<8x128xf32>
    %c8 = arith.constant 8 : index
    %c0_23 = arith.constant 0 : index
    %92 = vector.load %arg2[%c8, %c0_23] : memref<16x128xf32, #tpu.memory_space<vmem>>, vector<8x128xf32>
    tpu.vector_store %arg2[%c8, %c0_23], %91 {strides = array<i32>} : memref<16x128xf32, #tpu.memory_space<vmem>>, vector<8x128xf32>,
    return
  }
  func.func @transform_0(%arg0: i32) -> (i32, i32) {
    %c0_i32 = arith.constant 0 : i32
    %c0_i32_0 = arith.constant 0 : i32
    return %arg0, %c0_i32 : i32, i32
  }
  func.func @transform_1(%arg0: i32) -> (i32, i32) {
    %c0_i32 = arith.constant 0 : i32
    %c0_i32_0 = arith.constant 0 : i32
    return %arg0, %c0_i32 : i32, i32
  }
}

</mosaic_0001>

<bundles_post_ra>
// kernel: poisson_noise.1
= control target key start
LH: loop header
LB: loop body
LE: loop exit
PB: predicated region body
PF: predicated region fallthrough
CT: control target
= control target key end

     0   :  { %v16_v0 = vlaneseq  ;;  %v334_v37 = vmov 683565275   ;;  %v335_v39 = vmov 2475754826   ;;  %v336_v41 = vmov 2131351028   ;;  %s413_s0 = inlined_call_operand.vmem [shape: f32[16,128], index: 0, kind: input, shape index: {}]   ;;  %s414_s1 = inlined_call_operand.vmem [shape: f32[16,128], index: 1, kind: output, shape index: {}]  }
   0x1   :  { %v337_v43 = vmov 2102212464   ;;  %v338_v47 = vmov 920167782   ;;  %v339_v52 = vmov 1326507024  }
   0x2   :  { %v17_v1 = vshrl.u32 %v16_v0, 7  ;;  %v19_v2 = vand.u32 127, %v16_v0 }
   0x4   :  { %v23_v3 = vmul.u32 128, %v17_v1 }
   0x6   :  { %v24_v4 = vadd.s32 %v23_v3, %v19_v2 }
   0x8   :  { %v34_v5 = vadd.s32 3084996963, %v24_v4  ;;  %v25_v10 = vadd.s32 843314857, %v24_v4 }
   0xa   :  { %v35_v6 = vshrl.u32 %v34_v5, 16  ;;  %v26_v13 = vshrl.u32 %v25_v10, 16 }
   0xc   :  { %v36_v7 = vxor.u32 %v35_v6, %v34_v5  ;;  %v27_v16 = vxor.u32 %v26_v13, %v25_v10 }
   0xe   :  { %v37_v8 = vmul.u32 2246822507, %v36_v7  ;;  %v28_v19 = vmul.u32 2246822507, %v27_v16 }
  0x10   :  { %v38_v9 = vshrl.u32 %v37_v8, 13  ;;  %v29_v22 = vshrl.u32 %v28_v19, 13 }
  0x12   :  { %v39_v11 = vxor.u32 %v38_v9, %v37_v8  ;;  %v30_v25 = vxor.u32 %v29_v22, %v28_v19 }
  0x14   :  { %v40_v12 = vmul.u32 3266489909, %v39_v11  ;;  %v31_v29 = vmul.u32 3266489909, %v30_v25 }
  0x16   :  { %v41_v14 = vshrl.u32 %v40_v12, 16  ;;  %v32_v33 = vshrl.u32 %v31_v29, 16 }
  0x18   :  { %v42_v15 = vxor.u32 %v41_v14, %v40_v12  ;;  %v33_v54 = vxor.u32 %v32_v33, %v31_v29  ;;  %v8_v29 = vld [vmem:[%s413_s0] sm:$0xff] }
  0x1a   :  { %v47_v17 = vshrl.u32 %v42_v15, 9  ;;  %v43_v11 = vshrl.u32 %v33_v54, 9 }
  0x1c   :  { %v48_v18 = vor.u32 1065353216, %v47_v17  ;;  %v44_v16 = vor.u32 1065353216, %v43_v11 }
  0x1e   :  { %v303_v20 = vadd.f32 -1.0, %v48_v18  ;;  %v46_v19 = vsub.f32 2.0, %v44_v16 }
  0x20   :  { %v350_v21 = vmul.f32 6.2831855, %v303_v20  ;;  %322 = vlog2.f32 %v46_v19 }
  0x22   :  { %v65_v23 = vand.u32 2139095040, %v350_v21  ;;  %v62_v26 = vand.u32 2147483647, %v350_v21  ;;  %vm64_vm7 = vcmp.lt.s32.totalorder %v350_v21, 0 }
  0x24   :  { %v66_v24 = vshrl.u32 %v65_v23, 23  ;;  %v69_v30 = vand.u32 8388607, %v62_v26  ;;  %vm63_vm8 = vcmp.le.f32.partialorder %v62_v26, 0.7853982 }
  0x26   :  { %v304_v27 = vadd.s32 4294967169, %v66_v24  ;;  %v70_v34 = vor.u32 8388608, %v69_v30 }
  0x28   :  { %v72_v28 = vadd.s32 1, %v304_v27  ;;  %v110_v55 = vshll.u32 %v70_v34, 8  ;;  %v10_v34 = vmul.f32 100.0, %v8_v29 }
  0x2a   :  { %vm73_vm0 = vcmp.gt.s32.totalorder %v72_v28, 0 }
  0x2b   :  { %v74_v31 = vsel %vm73_vm0, %v72_v28, 0 }
  0x2c   :  { %v76_v32 = vand.u32 31, %v74_v31  ;;  %v75_v35 = vshrl.u32 %v74_v31, 5  ;;  %v9_v31 = vld [vmem:[%s413_s0 + $0x8] sm:$0xff] }
  0x2d   :  { %v323_v33 = vpop.eup %322 }
  0x2e   :  { %v77_v36 = vsub.s32 32, %v76_v32  ;;  %v79_v38 = vshll.u32 %v334_v37, %v76_v32  ;;  %v82_v40 = vshll.u32 %v335_v39, %v76_v32  ;;  %v85_v42 = vshll.u32 %v336_v41, %v76_v32 }
  0x2f   :  { %v88_v44 = vshll.u32 %v337_v43, %v76_v32  ;;  %v91_v48 = vshll.u32 %v338_v47, %v76_v32  ;;  %vm94_vm1 = vcmp.lt.s32.totalorder %v75_v35, 1  ;;  %vm95_vm2 = vcmp.lt.s32.totalorder %v75_v35, 2 }
  0x30   :  { %v80_v45 = vshrl.u32 %v335_v39, %v77_v36  ;;  %v83_v46 = vshrl.u32 %v336_v41, %v77_v36  ;;  %v78_v49 = vshrl.u32 %v334_v37, %v77_v36  ;;  %v86_v50 = vshrl.u32 %v337_v43, %v77_v36 }
  0x31   :  { %v89_v51 = vshrl.u32 %v338_v47, %v77_v36  ;;  %v92_v53 = vshrl.u32 %v339_v52, %v77_v36  ;;  %vm96_vm3 = vcmp.lt.s32.totalorder %v75_v35, 3  ;;  %vm97_vm4 = vcmp.lt.s32.totalorder %v75_v35, 4 }
  0x32   :  { %v81_v56 = vor.u32 %v80_v45, %v79_v38  ;;  %v84_v57 = vor.u32 %v83_v46, %v82_v40  ;;  %v87_v58 = vor.u32 %v86_v50, %v85_v42  ;;  %v11_v36 = vmul.f32 100.0, %v9_v31 }
  0x33   :  { %v90_v59 = vor.u32 %v89_v51, %v88_v44  ;;  %v93_v60 = vor.u32 %v92_v53, %v91_v48  ;;  %v52_v40 = vmul.f32 0.6931472, %v323_v33  ;;  %v12_v43 = vadd.f32 2.0, %v10_v34 }
  0x34   :  { %v98_v61 = vsel %vm94_vm1, %v78_v49, %v81_v56  ;;  %v99_v62 = vsel %vm97_vm4, %v87_v58, 2102212464  ;;  %v102_v63 = vsel %vm94_vm1, %v81_v56, %v84_v57  ;;  %v106_v3 = vsel %vm94_vm1, %v84_v57, %v87_v58 }
  0x35   :  { %v103_v0 = vsel %vm97_vm4, %v90_v59, 920167782  ;;  %v100_v1 = vsel %vm96_vm3, %v84_v57, %v99_v62  ;;  %v107_v4 = vsel %vm97_vm4, %v93_v60, 1326507024  ;;  %v13_v44 = vadd.f32 2.0, %v11_v36 }
  0x36   :  { %v104_v2 = vsel %vm96_vm3, %v87_v58, %v103_v0  ;;  %v108_v6 = vsel %vm96_vm3, %v90_v59, %v107_v4  ;;  %v101_v7 = vsel %vm95_vm2, %v98_v61, %v100_v1  ;;  %v53_v47 = vmul.f32 -2.0, %v52_v40 }
  0x37   :  { %v105_v5 = vsel %vm95_vm2, %v102_v63, %v104_v2  ;;  %v109_v8 = vsel %vm95_vm2, %v106_v3, %v108_v6  ;;  %v117_v14 = vmul.u32 %v110_v55, %v101_v7  ;;  %v375_v50 = vmax.f32 %v12_v43, 0.0 }
  0x38   :  { %v359_v9 = vmul.u32.u64.low %v110_v55, %v105_v5  ;;  %v360_v10 = vmul.u32.u64.high %v110_v55, %v105_v5, %v359_v9  ;;  %v362_v12 = vmul.u32.u64.low %v110_v55, %v109_v8  ;;  %v363_v13 = vmul.u32.u64.high %v110_v55, %v109_v8, %v362_v12 }
  0x39   :  { %v377_v51 = vmax.f32 %v13_v44, 0.0  ;;  %324 = vrsqrt.f32 %v53_v47  ;;  %vm273_vm9 = vcmp.eq.f32.partialorder %v375_v50, inf  ;;  %vm56_vm10 = vcmp.eq.f32.partialorder %v53_v47, inf }
  0x3a   :  { %v120_v15 = vadd.s32 1, %v360_v10  ;;  %vm119_vm5 = vc.u32 %v363_v13, %v359_v9  ;;  %v118_v32 = vadd.s32 %v359_v9, %v363_v13  ;;  %326 = vrsqrt.f32 %v375_v50 }
  0x3b   :  { %328 = vrsqrt.f32 %v377_v51  ;;  %vm275_vm11 = vcmp.eq.f32.partialorder %v375_v50, 0.0  ;;  %v276_v3 = vand.u32 2147483648, %v375_v50  ;;  %vm285_vm12 = vcmp.eq.f32.partialorder %v377_v51, inf }
  0x3c   :  { %v121_v17 = vsel %vm119_vm5, %v120_v15, %v360_v10  ;;  %vm287_vm13 = vcmp.eq.f32.partialorder %v377_v51, 0.0  ;;  %v288_v5 = vand.u32 2147483648, %v377_v51  ;;  %vm58_vm14 = vcmp.eq.f32.partialorder %v53_v47, 0.0 }
  0x3d   :  { %v122_v18 = vadd.s32 %v121_v17, %v117_v14  ;;  %v59_v7 = vand.u32 2147483648, %v53_v47  ;;  %vm154_vm5 = vweird.f32 %v350_v21 }
  0x3f   :  { %v123_v20 = vadd.s32 536870912, %v122_v18 }
  0x41   :  { %v124_v22 = vshrl.u32 %v123_v20, 30 }
  0x43   :  { %v125_v23 = vshll.u32 %v124_v22, 30  ;;  %v148_v54 = vsub.s32 4, %v124_v22 }
  0x45   :  { %v126_v24 = vsub.s32 %v122_v18, %v125_v23  ;;  %v149_v57 = vsel %vm64_vm7, %v148_v54, %v124_v22 }
  0x46   :  { %v151_v59 = vsel %vm63_vm8, 0, %v149_v57  ;;  %v325_v61 = vpop.eup %324 }
  0x47   :  { %v128_v25 = vsub.s32 0, %v126_v24  ;;  %v259_v60 = vadd.s32 3, %v151_v59  ;;  %v327_v62 = vpop.eup %326  ;;  %v155_v0 = vand.u32 3, %v151_v59  ;;  %v55_v2 = vmul.f32 %v325_v61, %v53_v47 }
  0x48   :  { %v329_v63 = vpop.eup %328  ;;  %v272_v26 = vmul.f32 %v327_v62, %v375_v50 }
  0x49   :  { %v305_v27 = vmin.u32 %v128_v25, %v126_v24  ;;  %v260_v1 = vand.u32 3, %v259_v60  ;;  %v284_v4 = vmul.f32 %v329_v63, %v377_v51  ;;  %vm160_vm15 = vcmp.eq.s32.totalorder %v155_v0, 2 }
  0x4a   :  { %v57_v9 = vsel %vm56_vm10, %v53_v47, %v55_v2  ;;  %vm157_vm1 = vcmp.eq.s32.totalorder %v155_v0, 0  ;;  %vm156_vm3 = vcmp.lt.s32.totalorder %v155_v0, 2  ;;  %v274_v12 = vsel %vm273_vm9, %v375_v50, %v272_v26 }
  0x4b   :  { %v130_v28 = vclz %v305_v27  ;;  %vm265_vm0 = vcmp.eq.s32.totalorder %v260_v1, 2  ;;  %vm262_vm2 = vcmp.eq.s32.totalorder %v260_v1, 0  ;;  %vm261_vm4 = vcmp.lt.s32.totalorder %v260_v1, 2 }
  0x4c   :  { %v286_v15 = vsel %vm285_vm12, %v377_v51, %v284_v4  ;;  %v60_v16 = vsel %vm58_vm14, %v59_v7, %v57_v9 }
  0x4d   :  { %v306_v30 = vadd.s32 4294967294, %v130_v28 }
  0x4f   :  { %vm307_vm6 = vcmp.lt.s32.totalorder %v306_v30, 0 }
  0x50   :  { %v133_v35 = vsel %vm307_vm6, 0, %v306_v30 }
  0x51   :  { %v134_v37 = vsub.s32 32, %v133_v35  ;;  %v135_v38 = vshll.u32 %v126_v24, %v133_v35  ;;  %v138_v39 = vsub.s32 4294967266, %v133_v35  ;;  %v277_v24 = vsel %vm275_vm11, %v276_v3, %v274_v12 }
  0x53   :  { %v136_v41 = vshrl.u32 %v118_v32, %v134_v37  ;;  %v139_v42 = vadd.s32 127, %v138_v39 }
  0x55   :  { %v137_v45 = vor.u32 %v136_v41, %v135_v38  ;;  %v140_v46 = vshll.u32 %v139_v42, 23 }
  0x57   :  { %v141_v48 = vor.u32 4788187, %v140_v46  ;;  %v144_v49 = vcvt.s32.f32 %v137_v45 }
  0x59   :  { %v142_v52 = vand.u32 2147483647, %v141_v48 }
  0x5b   :  { %v145_v53 = vmul.f32 %v144_v49, %v142_v52 }
  0x5d   :  { %v146_v55 = vxor.u32 2147483648, %v145_v53 }
  0x5f   :  { %v147_v56 = vsel %vm64_vm7, %v146_v55, %v145_v53 }
  0x60   :  { %v150_v58 = vsel %vm63_vm8, %v350_v21, %v147_v56  ;;  %v289_v21 = vsel %vm287_vm13, %v288_v5, %v286_v15 }
  0x61   :  { %330 = vcosq.f32 %v150_v58 }
  0x62   :  { %332 = vsinq.f32 %v150_v58 }
  0x6e   :  { %v331_v6 = vpop.eup %330 }
  0x6f   :  { %v333_v8 = vpop.eup %332  ;;  %v161_v10 = vxor.u32 2147483648, %v331_v6 }
  0x70   :  { %v158_v11 = vxor.u32 2147483648, %v333_v8 }
  0x71   :  { %v162_v13 = vsel %vm160_vm15, %v161_v10, %v333_v8  ;;  %v267_v14 = vsel %vm265_vm0, %v161_v10, %v333_v8 }
  0x72   :  { %v159_v17 = vsel %vm157_vm1, %v331_v6, %v158_v11  ;;  %v264_v18 = vsel %vm262_vm2, %v331_v6, %v158_v11 }
  0x73   :  { %v163_v19 = vsel %vm156_vm3, %v159_v17, %v162_v13  ;;  %v268_v20 = vsel %vm261_vm4, %v264_v18, %v267_v14 }
  0x74   :  { %v164_v22 = vsel %vm154_vm5, nan, %v163_v19  ;;  %v269_v23 = vsel %vm154_vm5, nan, %v268_v20 }
  0x75   :  { %v165_v25 = vmul.f32 %v164_v22, %v60_v16  ;;  %v270_v27 = vmul.f32 %v269_v23, %v60_v16 }
  0x77   :  { %v278_v28 = vmul.f32 %v277_v24, %v165_v25  ;;  %v290_v29 = vmul.f32 %v289_v21, %v270_v27 }
  0x79   :  { %v279_v30 = vadd.f32 %v278_v28, %v375_v50  ;;  %v291_v31 = vadd.f32 %v290_v29, %v377_v51 }
  0x7b   :  { %v280_v32 = vadd.f32 0.5, %v279_v30  ;;  %v292_v33 = vadd.f32 0.5, %v291_v31 }
  0x7d   :  { %v281_v34 = vfloor.f32 %v280_v32  ;;  %v293_v35 = vfloor.f32 %v292_v33 }
  0x7f   :  { %v282_v36 = vmax.f32 %v281_v34, 0.0  ;;  %v294_v37 = vmax.f32 %v293_v35, 0.0 }
  0x81   :  { %v295_v38 = vmul.f32 0.01, %v282_v36  ;;  %v297_v39 = vmul.f32 0.01, %v294_v37 }
  0x83   :  { %296 = vst [vmem:[%s414_s1] sm:$0xff] %v295_v38  ;;  %298 = vst [vmem:[%s414_s1 + $0x8] sm:$0xff] %v297_v39 }

</bundles_post_ra>
